<compile_context>
chip_gen: v7x
topology: tpu7x:2x2x1
jax: 0.10.0
libtpu: 0.0.40
codegen_flags: <defaults>
</compile_context>

<pallas_src>
import functools

import jax
import jax.numpy as jnp
from jax.experimental import pallas as pl
from jax.experimental.pallas import tpu as pltpu

LANES = 128


def _num_tensorcores_per_chip():
    """Heuristic: 2 for megacore chips (v4 / v5p / v7x), 1 otherwise (v5e / v6e)."""
    try:
        kind = (getattr(jax.devices()[0], "device_kind", "") or "").lower()
    except Exception:
        return 1
    if "v7" in kind or "v5p" in kind:
        return 2
    if "v4" in kind and "lite" not in kind:
        return 2
    return 1


# ----------------------------------------------------------------------------
# Kernel
# ----------------------------------------------------------------------------
def _flow_kernel(n_feat, n_hidden, n_dim, chunk_rows, p_ref, x_ref, e_ref, out_ref):
    """Fused MLP + single sigmoid-flow layer (tanh-folded) over one (tr,128) tile.

       p_ref  : packed params, flat f32 in SMEM
       x_ref  : (tr, 128) f32         monotone input
       e_ref  : (n_feat, tr, 128) f32 conditioning features
       out_ref: (tr, 128) f32
    """
    H, F, D = n_hidden, n_feat, n_dim
    # Packed parameter layout (flat, f32):
    o_w1 = 0                    # W1 (H, F) row-major
    o_b1 = o_w1 + H * F         # b1 (H,)
    o_w2 = o_b1 + H             # W2 (H,)   (from (1, H))
    o_b2 = o_w2 + H             # b2 scalar
    o_a = o_b2 + 1              # a' = 0.5*exp(log_a)  (D, 2) row-major
    o_bf = o_a + 2 * D          # b' = 0.5*b           (D,)
    o_ws = o_bf + D             # w' = 0.5*softmax(w)  (D,)

    n_chunks = x_ref.shape[0] // chunk_rows

    # Process the tile in small row-chunks so x / res / acc live in vregs instead
    # of spilling whole-tile temporaries to VMEM.
    @pl.loop(0, n_chunks)
    def _(c):
        r0 = pl.multiple_of(c * chunk_rows, chunk_rows)
        rs = pl.ds(r0, chunk_rows)
        x = x_ref[rs, :]                                   # (cr, 128)

        # --- MLP:  res = W2 @ relu(W1 @ e + b1) + b2   (VPU broadcast-FMAs)
        # TODO(synk): folding |W2| into W1/b1 only saves ops if sign(W2) were a
        # compile-time constant; weights are traced values, so keep the multiply.
        res = p_ref[o_b2]
        for j in range(H):
            h = p_ref[o_b1 + j]
            for k in range(F):
                h = h + p_ref[o_w1 + j * F + k] * e_ref[k, rs, :]
            res = res + p_ref[o_w2 + j] * jnp.maximum(h, 0.0)

        # --- sigmoid-flow layer, tanh-folded:
        #   sum_d softmax(w)_d * sigmoid(a_d0*x + a_d1*res + b_d)
        # = 0.5 + sum_d w'_d * tanh(a'_d0*x + a'_d1*res + b'_d)
        acc = 0.5
        for d in range(D):
            inner = (p_ref[o_a + 2 * d] * x
                     + p_ref[o_a + 2 * d + 1] * res
                     + p_ref[o_bf + d])
            acc = acc + p_ref[o_ws + d] * jnp.tanh(inner)

        out_ref[rs, :] = acc


# ----------------------------------------------------------------------------
# Wrapper
# ----------------------------------------------------------------------------
def sigmoid_flow_forward(x, extra, mlp_params, flow_params, *,
                         tile_rows=1024, chunk_rows=64):
    """x: (N,) ;  extra: (n_in-1, N).  Returns (N, 1, 1) float32."""
    w1, b1, w2, b2 = mlp_params
    log_a, b_flow, unnorm_w = flow_params

    x = x.reshape(-1).astype(jnp.float32)
    extra = extra.astype(jnp.float32)
    n_feat, N = extra.shape
    n_hidden = w1.shape[0]
    n_dim = log_a.shape[0]

    # --- tiny glue: tanh-fold the flow params, pack everything into one SMEM vector.
    a_f = 0.5 * jnp.exp(log_a.astype(jnp.float32))                      # (D, 2)
    b_f = 0.5 * b_flow.astype(jnp.float32).reshape(-1)                  # (D,)
    w_f = 0.5 * jax.nn.softmax(unnorm_w.astype(jnp.float32), axis=1).reshape(-1)
    params = jnp.concatenate([
        w1.astype(jnp.float32).reshape(-1), b1.astype(jnp.float32).reshape(-1),
        w2.astype(jnp.float32).reshape(-1), b2.astype(jnp.float32).reshape(-1),
        a_f.reshape(-1), b_f, w_f,
    ])

    # --- tile selection: balanced tiles matching the real row count.
    rows = pl.cdiv(N, LANES)                       # rows of 128 samples
    rows8 = ((rows + 7) // 8) * 8                  # sublane granularity
    cr = max(8, (min(int(chunk_rows), rows8) // 8) * 8)
    tile_rows = max(cr, int(tile_rows))
    n_steps = pl.cdiv(rows8, tile_rows)
    if _num_tensorcores_per_chip() >= 2 and rows8 >= 2 * cr:
        # megacore (v7x / v4 / v5p): even, >=2 equal-size steps so both TCs get work.
        n_steps = max(n_steps, 2)
        if n_steps % 2:
            n_steps += 1
    tr = pl.cdiv(pl.cdiv(rows8, n_steps), cr) * cr  # balanced, chunk-multiple
    R = n_steps * tr
    Np = R * LANES

    # --- lane/sublane-dense batch layout; zero-copy reshape when no padding needed.
    if Np == N:
        x2 = x.reshape(R, LANES)
        e3 = extra.reshape(n_feat, R, LANES)
    else:
        x2 = jnp.pad(x, (0, Np - N)).reshape(R, LANES)
        e3 = jnp.pad(extra, ((0, 0), (0, Np - N))).reshape(n_feat, R, LANES)

    kernel = functools.partial(_flow_kernel, n_feat, n_hidden, n_dim, cr)
    out = pl.pallas_call(
        kernel,
        out_shape=jax.ShapeDtypeStruct((R, LANES), jnp.float32),
        grid_spec=pltpu.PrefetchScalarGridSpec(
            num_scalar_prefetch=0,
            grid=(n_steps,),
            in_specs=[
                # packed scalar params live in SMEM (read as scalars in-kernel)
                pl.BlockSpec(memory_space=pltpu.MemorySpace.SMEM),
                # monotone input tile
                pl.BlockSpec((tr, LANES), lambda i: (i, 0)),
                # conditioning-feature tile
                pl.BlockSpec((n_feat, tr, LANES), lambda i: (0, i, 0)),
            ],
            out_specs=pl.BlockSpec((tr, LANES), lambda i: (i, 0)),
        ),
        compiler_params=pltpu.CompilerParams(
            dimension_semantics=("parallel",)),
    )(params, x2, e3)

    return out.reshape(-1)[:N].reshape(N, 1, 1)


# ----------------------------------------------------------------------------
# Pure-JAX reference (mirrors the PyTorch forward exactly, full f32 precision)
# ----------------------------------------------------------------------------
def reference_forward(x, extra, mlp_params, flow_params):
    w1, b1, w2, b2 = mlp_params
    log_a, b_flow, unnorm_w = flow_params
    hp = jax.lax.Precision.HIGHEST
    N = x.size
    xr = x.reshape(N, 1, 1)
    h = jnp.maximum(jnp.einsum('kn,jk->nj', extra, w1, precision=hp) + b1, 0.0)
    res = (jnp.einsum('nj,oj->no', h, w2, precision=hp) + b2).reshape(N, 1, 1)
    mono = jnp.concatenate([xr, res], axis=1)                        # (N, 2, 1)
    a = jnp.exp(log_a)
    inner = jnp.einsum('di,nij->ndj', a, mono, precision=hp) + b_flow
    out = jax.nn.sigmoid(inner)
    w = jax.nn.softmax(unnorm_w, axis=1)
    return jnp.einsum('od,ndj->noj', w, out, precision=hp)           # (N, 1, 1)


# ----------------------------------------------------------------------------
if __name__ == "__main__":
    # Module hyper-parameters (match SigmoidFlowNDSingleMLPDropout(n_in, num_layers, n_dim)).
    n_in = 5          # -> extra has n_in - 1 = 4 conditioning features
    num_layers = 2    # unused by the module's layer list (it holds a single OneLayerFlow)
    n_dim = 8
    n_hidden = 5      # MLP hidden width from the spec: Linear(n_in-1, 5)

    key = jax.random.PRNGKey(0)
    keys = jax.random.split(key, 16)
    ki = iter(range(16))

    def randn(shape, scale=0.5):
        return scale * jax.random.normal(keys[next(ki)], shape, jnp.float32)

    # MLP: Linear(n_in-1, 5) -> ReLU -> Linear(5, 1)
    mlp_params = (
        randn((n_hidden, n_in - 1), 0.4),   # W1
        randn((n_hidden,), 0.1),            # b1
        randn((1, n_hidden), 0.4),          # W2
        randn((1,), 0.1),                   # b2
    )
    # Single OneLayerFlow(in_dim=2, n_dim)
    flow_params = (
        randn((n_dim, 2)),                  # log_a
        randn((n_dim, 1)),                  # b
        randn((1, n_dim)),                  # unnormalized_w
    )

    def run_case(N, **kw):
        kx, ke = jax.random.split(jax.random.fold_in(key, N))
        x = jax.random.uniform(kx, (N,), jnp.float32)
        extra = jax.random.normal(ke, (n_in - 1, N), jnp.float32)
        out = jax.block_until_ready(
            sigmoid_flow_forward(x, extra, mlp_params, flow_params, **kw))
        ref = reference_forward(x, extra, mlp_params, flow_params)
        assert out.shape == (N, 1, 1)
        err = float(jnp.max(jnp.abs(out - ref)))
        assert jnp.allclose(out, ref, atol=2e-5, rtol=2e-5), err

    run_case(1000)                       # small, ragged tail (single small tile)
    run_case(40960)                      # zero-copy reshape path (320 full rows)
    run_case(40000)                      # padded tail, balanced single/dual tile
    run_case(40960, tile_rows=128)       # forced multi-step grid path

    # TODO(synk): module name mentions Dropout but the spec's forward has no dropout op.
    print("KERNEL_OK")
</pallas_src>

<mosaic_0001>
module attributes {stable_mosaic.version = 11 : i64} {
  func.func @_flow_kernel(%arg0: i32, %arg1: memref<63xf32, #tpu.memory_space<smem>>, %arg2: memref<8x128xf32, #tpu.memory_space<vmem>>, %arg3: memref<4x8x128xf32, #tpu.memory_space<vmem>>, %arg4: memref<8x128xf32, #tpu.memory_space<vmem>>) attributes {dimension_semantics = [#tpu.dimension_semantics<parallel>], iteration_bounds = array<i64: 1>, scalar_prefetch = 0 : i64, scratch_operands = 0 : i64, tpu.core_type = #tpu.core_type<tc>, window_params = [{transform_indices = @transform_0, window_bounds = array<i64: 63>}, {transform_indices = @transform_1, window_bounds = array<i64: 8, 128>}, {transform_indices = @transform_2, window_bounds = array<i64: 4, 8, 128>}, {transform_indices = @transform_3, window_bounds = array<i64: 8, 128>}]} {
    %c0_i32 = arith.constant 0 : i32
    %c1_i32 = arith.constant 1 : i32
    %0 = arith.muli %c0_i32, %c1_i32 : i32
    %c0_i32_0 = arith.constant 0 : i32
    %1 = arith.addi %c0_i32_0, %0 : i32
    %c8_i32 = arith.constant 8 : i32
    %2 = arith.muli %1, %c8_i32 : i32
    %3 = tpu.assume_multiple %2, 8 : i32
    %4 = arith.index_cast %3 : i32 to index
    %c0 = arith.constant 0 : index
    %5 = vector.load %arg2[%4, %c0] : memref<8x128xf32, #tpu.memory_space<vmem>>, vector<8x128xf32>
    %c30 = arith.constant 30 : index
    %6 = memref.load %arg1[%c30] : memref<63xf32, #tpu.memory_space<smem>>
    %c20 = arith.constant 20 : index
    %7 = memref.load %arg1[%c20] : memref<63xf32, #tpu.memory_space<smem>>
    %c0_1 = arith.constant 0 : index
    %8 = memref.load %arg1[%c0_1] : memref<63xf32, #tpu.memory_space<smem>>
    %c0_2 = arith.constant 0 : index
    %9 = arith.index_cast %3 : i32 to index
    %c0_3 = arith.constant 0 : index
    %10 = vector.load %arg3[%c0_2, %9, %c0_3] : memref<4x8x128xf32, #tpu.memory_space<vmem>>, vector<1x8x128xf32>
    %11 = vector.shape_cast %10 : vector<1x8x128xf32> to vector<8x128xf32>
    %12 = vector.broadcast %8 : f32 to vector<8x128xf32>
    %13 = arith.mulf %12, %11 : vector<8x128xf32>
    %14 = vector.broadcast %7 : f32 to vector<8x128xf32>
    %15 = arith.addf %14, %13 : vector<8x128xf32>
    %c1 = arith.constant 1 : index
    %16 = memref.load %arg1[%c1] : memref<63xf32, #tpu.memory_space<smem>>
    %c1_4 = arith.constant 1 : index
    %17 = arith.index_cast %3 : i32 to index
    %c0_5 = arith.constant 0 : index
    %18 = vector.load %arg3[%c1_4, %17, %c0_5] : memref<4x8x128xf32, #tpu.memory_space<vmem>>, vector<1x8x128xf32>
    %19 = vector.shape_cast %18 : vector<1x8x128xf32> to vector<8x128xf32>
    %20 = vector.broadcast %16 : f32 to vector<8x128xf32>
    %21 = arith.mulf %20, %19 : vector<8x128xf32>
    %22 = arith.addf %15, %21 : vector<8x128xf32>
    %c2 = arith.constant 2 : index
    %23 = memref.load %arg1[%c2] : memref<63xf32, #tpu.memory_space<smem>>
    %c2_6 = arith.constant 2 : index
    %24 = arith.index_cast %3 : i32 to index
    %c0_7 = arith.constant 0 : index
    %25 = vector.load %arg3[%c2_6, %24, %c0_7] : memref<4x8x128xf32, #tpu.memory_space<vmem>>, vector<1x8x128xf32>
    %26 = vector.shape_cast %25 : vector<1x8x128xf32> to vector<8x128xf32>
    %27 = vector.broadcast %23 : f32 to vector<8x128xf32>
    %28 = arith.mulf %27, %26 : vector<8x128xf32>
    %29 = arith.addf %22, %28 : vector<8x128xf32>
    %c3 = arith.constant 3 : index
    %30 = memref.load %arg1[%c3] : memref<63xf32, #tpu.memory_space<smem>>
    %c3_8 = arith.constant 3 : index
    %31 = arith.index_cast %3 : i32 to index
    %c0_9 = arith.constant 0 : index
    %32 = vector.load %arg3[%c3_8, %31, %c0_9] : memref<4x8x128xf32, #tpu.memory_space<vmem>>, vector<1x8x128xf32>
    %33 = vector.shape_cast %32 : vector<1x8x128xf32> to vector<8x128xf32>
    %34 = vector.broadcast %30 : f32 to vector<8x128xf32>
    %35 = arith.mulf %34, %33 : vector<8x128xf32>
    %36 = arith.addf %29, %35 : vector<8x128xf32>
    %c25 = arith.constant 25 : index
    %37 = memref.load %arg1[%c25] : memref<63xf32, #tpu.memory_space<smem>>
    %cst = arith.constant 0.000000e+00 : f32
    %38 = vector.broadcast %cst : f32 to vector<8x128xf32>
    %39 = arith.maximumf %36, %38 : vector<8x128xf32>
    %40 = vector.broadcast %37 : f32 to vector<8x128xf32>
    %41 = arith.mulf %40, %39 : vector<8x128xf32>
    %42 = vector.broadcast %6 : f32 to vector<8x128xf32>
    %43 = arith.addf %42, %41 : vector<8x128xf32>
    %c21 = arith.constant 21 : index
    %44 = memref.load %arg1[%c21] : memref<63xf32, #tpu.memory_space<smem>>
    %c4 = arith.constant 4 : index
    %45 = memref.load %arg1[%c4] : memref<63xf32, #tpu.memory_space<smem>>
    %c0_10 = arith.constant 0 : index
    %46 = arith.index_cast %3 : i32 to index
    %c0_11 = arith.constant 0 : index
    %47 = vector.load %arg3[%c0_10, %46, %c0_11] : memref<4x8x128xf32, #tpu.memory_space<vmem>>, vector<1x8x128xf32>
    %48 = vector.shape_cast %47 : vector<1x8x128xf32> to vector<8x128xf32>
    %49 = vector.broadcast %45 : f32 to vector<8x128xf32>
    %50 = arith.mulf %49, %48 : vector<8x128xf32>
    %51 = vector.broadcast %44 : f32 to vector<8x128xf32>
    %52 = arith.addf %51, %50 : vector<8x128xf32>
    %c5 = arith.constant 5 : index
    %53 = memref.load %arg1[%c5] : memref<63xf32, #tpu.memory_space<smem>>
    %c1_12 = arith.constant 1 : index
    %54 = arith.index_cast %3 : i32 to index
    %c0_13 = arith.constant 0 : index
    %55 = vector.load %arg3[%c1_12, %54, %c0_13] : memref<4x8x128xf32, #tpu.memory_space<vmem>>, vector<1x8x128xf32>
    %56 = vector.shape_cast %55 : vector<1x8x128xf32> to vector<8x128xf32>
    %57 = vector.broadcast %53 : f32 to vector<8x128xf32>
    %58 = arith.mulf %57, %56 : vector<8x128xf32>
    %59 = arith.addf %52, %58 : vector<8x128xf32>
    %c6 = arith.constant 6 : index
    %60 = memref.load %arg1[%c6] : memref<63xf32, #tpu.memory_space<smem>>
    %c2_14 = arith.constant 2 : index
    %61 = arith.index_cast %3 : i32 to index
    %c0_15 = arith.constant 0 : index
    %62 = vector.load %arg3[%c2_14, %61, %c0_15] : memref<4x8x128xf32, #tpu.memory_space<vmem>>, vector<1x8x128xf32>
    %63 = vector.shape_cast %62 : vector<1x8x128xf32> to vector<8x128xf32>
    %64 = vector.broadcast %60 : f32 to vector<8x128xf32>
    %65 = arith.mulf %64, %63 : vector<8x128xf32>
    %66 = arith.addf %59, %65 : vector<8x128xf32>
    %c7 = arith.constant 7 : index
    %67 = memref.load %arg1[%c7] : memref<63xf32, #tpu.memory_space<smem>>
    %c3_16 = arith.constant 3 : index
    %68 = arith.index_cast %3 : i32 to index
    %c0_17 = arith.constant 0 : index
    %69 = vector.load %arg3[%c3_16, %68, %c0_17] : memref<4x8x128xf32, #tpu.memory_space<vmem>>, vector<1x8x128xf32>
    %70 = vector.shape_cast %69 : vector<1x8x128xf32> to vector<8x128xf32>
    %71 = vector.broadcast %67 : f32 to vector<8x128xf32>
    %72 = arith.mulf %71, %70 : vector<8x128xf32>
    %73 = arith.addf %66, %72 : vector<8x128xf32>
    %c26 = arith.constant 26 : index
    %74 = memref.load %arg1[%c26] : memref<63xf32, #tpu.memory_space<smem>>
    %cst_18 = arith.constant 0.000000e+00 : f32
    %75 = vector.broadcast %cst_18 : f32 to vector<8x128xf32>
    %76 = arith.maximumf %73, %75 : vector<8x128xf32>
    %77 = vector.broadcast %74 : f32 to vector<8x128xf32>
    %78 = arith.mulf %77, %76 : vector<8x128xf32>
    %79 = arith.addf %43, %78 : vector<8x128xf32>
    %c22 = arith.constant 22 : index
    %80 = memref.load %arg1[%c22] : memref<63xf32, #tpu.memory_space<smem>>
    %c8 = arith.constant 8 : index
    %81 = memref.load %arg1[%c8] : memref<63xf32, #tpu.memory_space<smem>>
    %c0_19 = arith.constant 0 : index
    %82 = arith.index_cast %3 : i32 to index
    %c0_20 = arith.constant 0 : index
    %83 = vector.load %arg3[%c0_19, %82, %c0_20] : memref<4x8x128xf32, #tpu.memory_space<vmem>>, vector<1x8x128xf32>
    %84 = vector.shape_cast %83 : vector<1x8x128xf32> to vector<8x128xf32>
    %85 = vector.broadcast %81 : f32 to vector<8x128xf32>
    %86 = arith.mulf %85, %84 : vector<8x128xf32>
    %87 = vector.broadcast %80 : f32 to vector<8x128xf32>
    %88 = arith.addf %87, %86 : vector<8x128xf32>
    %c9 = arith.constant 9 : index
    %89 = memref.load %arg1[%c9] : memref<63xf32, #tpu.memory_space<smem>>
    %c1_21 = arith.constant 1 : index
    %90 = arith.index_cast %3 : i32 to index
    %c0_22 = arith.constant 0 : index
    %91 = vector.load %arg3[%c1_21, %90, %c0_22] : memref<4x8x128xf32, #tpu.memory_space<vmem>>, vector<1x8x128xf32>
    %92 = vector.shape_cast %91 : vector<1x8x128xf32> to vector<8x128xf32>
    %93 = vector.broadcast %89 : f32 to vector<8x128xf32>
    %94 = arith.mulf %93, %92 : vector<8x128xf32>
    %95 = arith.addf %88, %94 : vector<8x128xf32>
    %c10 = arith.constant 10 : index
    %96 = memref.load %arg1[%c10] : memref<63xf32, #tpu.memory_space<smem>>
    %c2_23 = arith.constant 2 : index
    %97 = arith.index_cast %3 : i32 to index
    %c0_24 = arith.constant 0 : index
    %98 = vector.load %arg3[%c2_23, %97, %c0_24] : memref<4x8x128xf32, #tpu.memory_space<vmem>>, vector<1x8x128xf32>
    %99 = vector.shape_cast %98 : vector<1x8x128xf32> to vector<8x128xf32>
    %100 = vector.broadcast %96 : f32 to vector<8x128xf32>
    %101 = arith.mulf %100, %99 : vector<8x128xf32>
    %102 = arith.addf %95, %101 : vector<8x128xf32>
    %c11 = arith.constant 11 : index
    %103 = memref.load %arg1[%c11] : memref<63xf32, #tpu.memory_space<smem>>
    %c3_25 = arith.constant 3 : index
    %104 = arith.index_cast %3 : i32 to index
    %c0_26 = arith.constant 0 : index
    %105 = vector.load %arg3[%c3_25, %104, %c0_26] : memref<4x8x128xf32, #tpu.memory_space<vmem>>, vector<1x8x128xf32>
    %106 = vector.shape_cast %105 : vector<1x8x128xf32> to vector<8x128xf32>
    %107 = vector.broadcast %103 : f32 to vector<8x128xf32>
    %108 = arith.mulf %107, %106 : vector<8x128xf32>
    %109 = arith.addf %102, %108 : vector<8x128xf32>
    %c27 = arith.constant 27 : index
    %110 = memref.load %arg1[%c27] : memref<63xf32, #tpu.memory_space<smem>>
    %cst_27 = arith.constant 0.000000e+00 : f32
    %111 = vector.broadcast %cst_27 : f32 to vector<8x128xf32>
    %112 = arith.maximumf %109, %111 : vector<8x128xf32>
    %113 = vector.broadcast %110 : f32 to vector<8x128xf32>
    %114 = arith.mulf %113, %112 : vector<8x128xf32>
    %115 = arith.addf %79, %114 : vector<8x128xf32>
    %c23 = arith.constant 23 : index
    %116 = memref.load %arg1[%c23] : memref<63xf32, #tpu.memory_space<smem>>
    %c12 = arith.constant 12 : index
    %117 = memref.load %arg1[%c12] : memref<63xf32, #tpu.memory_space<smem>>
    %c0_28 = arith.constant 0 : index
    %118 = arith.index_cast %3 : i32 to index
    %c0_29 = arith.constant 0 : index
    %119 = vector.load %arg3[%c0_28, %118, %c0_29] : memref<4x8x128xf32, #tpu.memory_space<vmem>>, vector<1x8x128xf32>
    %120 = vector.shape_cast %119 : vector<1x8x128xf32> to vector<8x128xf32>
    %121 = vector.broadcast %117 : f32 to vector<8x128xf32>
    %122 = arith.mulf %121, %120 : vector<8x128xf32>
    %123 = vector.broadcast %116 : f32 to vector<8x128xf32>
    %124 = arith.addf %123, %122 : vector<8x128xf32>
    %c13 = arith.constant 13 : index
    %125 = memref.load %arg1[%c13] : memref<63xf32, #tpu.memory_space<smem>>
    %c1_30 = arith.constant 1 : index
    %126 = arith.index_cast %3 : i32 to index
    %c0_31 = arith.constant 0 : index
    %127 = vector.load %arg3[%c1_30, %126, %c0_31] : memref<4x8x128xf32, #tpu.memory_space<vmem>>, vector<1x8x128xf32>
    %128 = vector.shape_cast %127 : vector<1x8x128xf32> to vector<8x128xf32>
    %129 = vector.broadcast %125 : f32 to vector<8x128xf32>
    %130 = arith.mulf %129, %128 : vector<8x128xf32>
    %131 = arith.addf %124, %130 : vector<8x128xf32>
    %c14 = arith.constant 14 : index
    %132 = memref.load %arg1[%c14] : memref<63xf32, #tpu.memory_space<smem>>
    %c2_32 = arith.constant 2 : index
    %133 = arith.index_cast %3 : i32 to index
    %c0_33 = arith.constant 0 : index
    %134 = vector.load %arg3[%c2_32, %133, %c0_33] : memref<4x8x128xf32, #tpu.memory_space<vmem>>, vector<1x8x128xf32>
    %135 = vector.shape_cast %134 : vector<1x8x128xf32> to vector<8x128xf32>
    %136 = vector.broadcast %132 : f32 to vector<8x128xf32>
    %137 = arith.mulf %136, %135 : vector<8x128xf32>
    %138 = arith.addf %131, %137 : vector<8x128xf32>
    %c15 = arith.constant 15 : index
    %139 = memref.load %arg1[%c15] : memref<63xf32, #tpu.memory_space<smem>>
    %c3_34 = arith.constant 3 : index
    %140 = arith.index_cast %3 : i32 to index
    %c0_35 = arith.constant 0 : index
    %141 = vector.load %arg3[%c3_34, %140, %c0_35] : memref<4x8x128xf32, #tpu.memory_space<vmem>>, vector<1x8x128xf32>
    %142 = vector.shape_cast %141 : vector<1x8x128xf32> to vector<8x128xf32>
    %143 = vector.broadcast %139 : f32 to vector<8x128xf32>
    %144 = arith.mulf %143, %142 : vector<8x128xf32>
    %145 = arith.addf %138, %144 : vector<8x128xf32>
    %c28 = arith.constant 28 : index
    %146 = memref.load %arg1[%c28] : memref<63xf32, #tpu.memory_space<smem>>
    %cst_36 = arith.constant 0.000000e+00 : f32
    %147 = vector.broadcast %cst_36 : f32 to vector<8x128xf32>
    %148 = arith.maximumf %145, %147 : vector<8x128xf32>
    %149 = vector.broadcast %146 : f32 to vector<8x128xf32>
    %150 = arith.mulf %149, %148 : vector<8x128xf32>
    %151 = arith.addf %115, %150 : vector<8x128xf32>
    %c24 = arith.constant 24 : index
    %152 = memref.load %arg1[%c24] : memref<63xf32, #tpu.memory_space<smem>>
    %c16 = arith.constant 16 : index
    %153 = memref.load %arg1[%c16] : memref<63xf32, #tpu.memory_space<smem>>
    %c0_37 = arith.constant 0 : index
    %154 = arith.index_cast %3 : i32 to index
    %c0_38 = arith.constant 0 : index
    %155 = vector.load %arg3[%c0_37, %154, %c0_38] : memref<4x8x128xf32, #tpu.memory_space<vmem>>, vector<1x8x128xf32>
    %156 = vector.shape_cast %155 : vector<1x8x128xf32> to vector<8x128xf32>
    %157 = vector.broadcast %153 : f32 to vector<8x128xf32>
    %158 = arith.mulf %157, %156 : vector<8x128xf32>
    %159 = vector.broadcast %152 : f32 to vector<8x128xf32>
    %160 = arith.addf %159, %158 : vector<8x128xf32>
    %c17 = arith.constant 17 : index
    %161 = memref.load %arg1[%c17] : memref<63xf32, #tpu.memory_space<smem>>
    %c1_39 = arith.constant 1 : index
    %162 = arith.index_cast %3 : i32 to index
    %c0_40 = arith.constant 0 : index
    %163 = vector.load %arg3[%c1_39, %162, %c0_40] : memref<4x8x128xf32, #tpu.memory_space<vmem>>, vector<1x8x128xf32>
    %164 = vector.shape_cast %163 : vector<1x8x128xf32> to vector<8x128xf32>
    %165 = vector.broadcast %161 : f32 to vector<8x128xf32>
    %166 = arith.mulf %165, %164 : vector<8x128xf32>
    %167 = arith.addf %160, %166 : vector<8x128xf32>
    %c18 = arith.constant 18 : index
    %168 = memref.load %arg1[%c18] : memref<63xf32, #tpu.memory_space<smem>>
    %c2_41 = arith.constant 2 : index
    %169 = arith.index_cast %3 : i32 to index
    %c0_42 = arith.constant 0 : index
    %170 = vector.load %arg3[%c2_41, %169, %c0_42] : memref<4x8x128xf32, #tpu.memory_space<vmem>>, vector<1x8x128xf32>
    %171 = vector.shape_cast %170 : vector<1x8x128xf32> to vector<8x128xf32>
    %172 = vector.broadcast %168 : f32 to vector<8x128xf32>
    %173 = arith.mulf %172, %171 : vector<8x128xf32>
    %174 = arith.addf %167, %173 : vector<8x128xf32>
    %c19 = arith.constant 19 : index
    %175 = memref.load %arg1[%c19] : memref<63xf32, #tpu.memory_space<smem>>
    %c3_43 = arith.constant 3 : index
    %176 = arith.index_cast %3 : i32 to index
    %c0_44 = arith.constant 0 : index
    %177 = vector.load %arg3[%c3_43, %176, %c0_44] : memref<4x8x128xf32, #tpu.memory_space<vmem>>, vector<1x8x128xf32>
    %178 = vector.shape_cast %177 : vector<1x8x128xf32> to vector<8x128xf32>
    %179 = vector.broadcast %175 : f32 to vector<8x128xf32>
    %180 = arith.mulf %179, %178 : vector<8x128xf32>
    %181 = arith.addf %174, %180 : vector<8x128xf32>
    %c29 = arith.constant 29 : index
    %182 = memref.load %arg1[%c29] : memref<63xf32, #tpu.memory_space<smem>>
    %cst_45 = arith.constant 0.000000e+00 : f32
    %183 = vector.broadcast %cst_45 : f32 to vector<8x128xf32>
    %184 = arith.maximumf %181, %183 : vector<8x128xf32>
    %185 = vector.broadcast %182 : f32 to vector<8x128xf32>
    %186 = arith.mulf %185, %184 : vector<8x128xf32>
    %187 = arith.addf %151, %186 : vector<8x128xf32>
    %c31 = arith.constant 31 : index
    %188 = memref.load %arg1[%c31] : memref<63xf32, #tpu.memory_space<smem>>
    %189 = vector.broadcast %188 : f32 to vector<8x128xf32>
    %190 = arith.mulf %189, %5 : vector<8x128xf32>
    %c32 = arith.constant 32 : index
    %191 = memref.load %arg1[%c32] : memref<63xf32, #tpu.memory_space<smem>>
    %192 = vector.broadcast %191 : f32 to vector<8x128xf32>
    %193 = arith.mulf %192, %187 : vector<8x128xf32>
    %194 = arith.addf %190, %193 : vector<8x128xf32>
    %c47 = arith.constant 47 : index
    %195 = memref.load %arg1[%c47] : memref<63xf32, #tpu.memory_space<smem>>
    %196 = vector.broadcast %195 : f32 to vector<8x128xf32>
    %197 = arith.addf %194, %196 : vector<8x128xf32>
    %c55 = arith.constant 55 : index
    %198 = memref.load %arg1[%c55] : memref<63xf32, #tpu.memory_space<smem>>
    %199 = math.tanh %197 : vector<8x128xf32>
    %200 = vector.broadcast %198 : f32 to vector<8x128xf32>
    %201 = arith.mulf %200, %199 : vector<8x128xf32>
    %cst_46 = arith.constant 5.000000e-01 : f32
    %202 = vector.broadcast %cst_46 : f32 to vector<8x128xf32>
    %203 = arith.addf %202, %201 : vector<8x128xf32>
    %c33 = arith.constant 33 : index
    %204 = memref.load %arg1[%c33] : memref<63xf32, #tpu.memory_space<smem>>
    %205 = vector.broadcast %204 : f32 to vector<8x128xf32>
    %206 = arith.mulf %205, %5 : vector<8x128xf32>
    %c34 = arith.constant 34 : index
    %207 = memref.load %arg1[%c34] : memref<63xf32, #tpu.memory_space<smem>>
    %208 = vector.broadcast %207 : f32 to vector<8x128xf32>
    %209 = arith.mulf %208, %187 : vector<8x128xf32>
    %210 = arith.addf %206, %209 : vector<8x128xf32>
    %c48 = arith.constant 48 : index
    %211 = memref.load %arg1[%c48] : memref<63xf32, #tpu.memory_space<smem>>
    %212 = vector.broadcast %211 : f32 to vector<8x128xf32>
    %213 = arith.addf %210, %212 : vector<8x128xf32>
    %c56 = arith.constant 56 : index
    %214 = memref.load %arg1[%c56] : memref<63xf32, #tpu.memory_space<smem>>
    %215 = math.tanh %213 : vector<8x128xf32>
    %216 = vector.broadcast %214 : f32 to vector<8x128xf32>
    %217 = arith.mulf %216, %215 : vector<8x128xf32>
    %218 = arith.addf %203, %217 : vector<8x128xf32>
    %c35 = arith.constant 35 : index
    %219 = memref.load %arg1[%c35] : memref<63xf32, #tpu.memory_space<smem>>
    %220 = vector.broadcast %219 : f32 to vector<8x128xf32>
    %221 = arith.mulf %220, %5 : vector<8x128xf32>
    %c36 = arith.constant 36 : index
    %222 = memref.load %arg1[%c36] : memref<63xf32, #tpu.memory_space<smem>>
    %223 = vector.broadcast %222 : f32 to vector<8x128xf32>
    %224 = arith.mulf %223, %187 : vector<8x128xf32>
    %225 = arith.addf %221, %224 : vector<8x128xf32>
    %c49 = arith.constant 49 : index
    %226 = memref.load %arg1[%c49] : memref<63xf32, #tpu.memory_space<smem>>
    %227 = vector.broadcast %226 : f32 to vector<8x128xf32>
    %228 = arith.addf %225, %227 : vector<8x128xf32>
    %c57 = arith.constant 57 : index
    %229 = memref.load %arg1[%c57] : memref<63xf32, #tpu.memory_space<smem>>
    %230 = math.tanh %228 : vector<8x128xf32>
    %231 = vector.broadcast %229 : f32 to vector<8x128xf32>
    %232 = arith.mulf %231, %230 : vector<8x128xf32>
    %233 = arith.addf %218, %232 : vector<8x128xf32>
    %c37 = arith.constant 37 : index
    %234 = memref.load %arg1[%c37] : memref<63xf32, #tpu.memory_space<smem>>
    %235 = vector.broadcast %234 : f32 to vector<8x128xf32>
    %236 = arith.mulf %235, %5 : vector<8x128xf32>
    %c38 = arith.constant 38 : index
    %237 = memref.load %arg1[%c38] : memref<63xf32, #tpu.memory_space<smem>>
    %238 = vector.broadcast %237 : f32 to vector<8x128xf32>
    %239 = arith.mulf %238, %187 : vector<8x128xf32>
    %240 = arith.addf %236, %239 : vector<8x128xf32>
    %c50 = arith.constant 50 : index
    %241 = memref.load %arg1[%c50] : memref<63xf32, #tpu.memory_space<smem>>
    %242 = vector.broadcast %241 : f32 to vector<8x128xf32>
    %243 = arith.addf %240, %242 : vector<8x128xf32>
    %c58 = arith.constant 58 : index
    %244 = memref.load %arg1[%c58] : memref<63xf32, #tpu.memory_space<smem>>
    %245 = math.tanh %243 : vector<8x128xf32>
    %246 = vector.broadcast %244 : f32 to vector<8x128xf32>
    %247 = arith.mulf %246, %245 : vector<8x128xf32>
    %248 = arith.addf %233, %247 : vector<8x128xf32>
    %c39 = arith.constant 39 : index
    %249 = memref.load %arg1[%c39] : memref<63xf32, #tpu.memory_space<smem>>
    %250 = vector.broadcast %249 : f32 to vector<8x128xf32>
    %251 = arith.mulf %250, %5 : vector<8x128xf32>
    %c40 = arith.constant 40 : index
    %252 = memref.load %arg1[%c40] : memref<63xf32, #tpu.memory_space<smem>>
    %253 = vector.broadcast %252 : f32 to vector<8x128xf32>
    %254 = arith.mulf %253, %187 : vector<8x128xf32>
    %255 = arith.addf %251, %254 : vector<8x128xf32>
    %c51 = arith.constant 51 : index
    %256 = memref.load %arg1[%c51] : memref<63xf32, #tpu.memory_space<smem>>
    %257 = vector.broadcast %256 : f32 to vector<8x128xf32>
    %258 = arith.addf %255, %257 : vector<8x128xf32>
    %c59 = arith.constant 59 : index
    %259 = memref.load %arg1[%c59] : memref<63xf32, #tpu.memory_space<smem>>
    %260 = math.tanh %258 : vector<8x128xf32>
    %261 = vector.broadcast %259 : f32 to vector<8x128xf32>
    %262 = arith.mulf %261, %260 : vector<8x128xf32>
    %263 = arith.addf %248, %262 : vector<8x128xf32>
    %c41 = arith.constant 41 : index
    %264 = memref.load %arg1[%c41] : memref<63xf32, #tpu.memory_space<smem>>
    %265 = vector.broadcast %264 : f32 to vector<8x128xf32>
    %266 = arith.mulf %265, %5 : vector<8x128xf32>
    %c42 = arith.constant 42 : index
    %267 = memref.load %arg1[%c42] : memref<63xf32, #tpu.memory_space<smem>>
    %268 = vector.broadcast %267 : f32 to vector<8x128xf32>
    %269 = arith.mulf %268, %187 : vector<8x128xf32>
    %270 = arith.addf %266, %269 : vector<8x128xf32>
    %c52 = arith.constant 52 : index
    %271 = memref.load %arg1[%c52] : memref<63xf32, #tpu.memory_space<smem>>
    %272 = vector.broadcast %271 : f32 to vector<8x128xf32>
    %273 = arith.addf %270, %272 : vector<8x128xf32>
    %c60 = arith.constant 60 : index
    %274 = memref.load %arg1[%c60] : memref<63xf32, #tpu.memory_space<smem>>
    %275 = math.tanh %273 : vector<8x128xf32>
    %276 = vector.broadcast %274 : f32 to vector<8x128xf32>
    %277 = arith.mulf %276, %275 : vector<8x128xf32>
    %278 = arith.addf %263, %277 : vector<8x128xf32>
    %c43 = arith.constant 43 : index
    %279 = memref.load %arg1[%c43] : memref<63xf32, #tpu.memory_space<smem>>
    %280 = vector.broadcast %279 : f32 to vector<8x128xf32>
    %281 = arith.mulf %280, %5 : vector<8x128xf32>
    %c44 = arith.constant 44 : index
    %282 = memref.load %arg1[%c44] : memref<63xf32, #tpu.memory_space<smem>>
    %283 = vector.broadcast %282 : f32 to vector<8x128xf32>
    %284 = arith.mulf %283, %187 : vector<8x128xf32>
    %285 = arith.addf %281, %284 : vector<8x128xf32>
    %c53 = arith.constant 53 : index
    %286 = memref.load %arg1[%c53] : memref<63xf32, #tpu.memory_space<smem>>
    %287 = vector.broadcast %286 : f32 to vector<8x128xf32>
    %288 = arith.addf %285, %287 : vector<8x128xf32>
    %c61 = arith.constant 61 : index
    %289 = memref.load %arg1[%c61] : memref<63xf32, #tpu.memory_space<smem>>
    %290 = math.tanh %288 : vector<8x128xf32>
    %291 = vector.broadcast %289 : f32 to vector<8x128xf32>
    %292 = arith.mulf %291, %290 : vector<8x128xf32>
    %293 = arith.addf %278, %292 : vector<8x128xf32>
    %c45 = arith.constant 45 : index
    %294 = memref.load %arg1[%c45] : memref<63xf32, #tpu.memory_space<smem>>
    %295 = vector.broadcast %294 : f32 to vector<8x128xf32>
    %296 = arith.mulf %295, %5 : vector<8x128xf32>
    %c46 = arith.constant 46 : index
    %297 = memref.load %arg1[%c46] : memref<63xf32, #tpu.memory_space<smem>>
    %298 = vector.broadcast %297 : f32 to vector<8x128xf32>
    %299 = arith.mulf %298, %187 : vector<8x128xf32>
    %300 = arith.addf %296, %299 : vector<8x128xf32>
    %c54 = arith.constant 54 : index
    %301 = memref.load %arg1[%c54] : memref<63xf32, #tpu.memory_space<smem>>
    %302 = vector.broadcast %301 : f32 to vector<8x128xf32>
    %303 = arith.addf %300, %302 : vector<8x128xf32>
    %c62 = arith.constant 62 : index
    %304 = memref.load %arg1[%c62] : memref<63xf32, #tpu.memory_space<smem>>
    %305 = math.tanh %303 : vector<8x128xf32>
    %306 = vector.broadcast %304 : f32 to vector<8x128xf32>
    %307 = arith.mulf %306, %305 : vector<8x128xf32>
    %308 = arith.addf %293, %307 : vector<8x128xf32>
    %309 = arith.index_cast %3 : i32 to index
    %c0_47 = arith.constant 0 : index
    %310 = vector.load %arg4[%309, %c0_47] : memref<8x128xf32, #tpu.memory_space<vmem>>, vector<8x128xf32>
    tpu.vector_store %arg4[%309, %c0_47], %308 {strides = array<i32>} : memref<8x128xf32, #tpu.memory_space<vmem>>, vector<8x128xf32>,
    %c1_i32_48 = arith.constant 1 : i32
    return
  }
  func.func @transform_0(%arg0: i32) -> i32 {
    %c0_i32 = arith.constant 0 : i32
    %c0_i32_0 = arith.constant 0 : i32
    return %c0_i32 : i32
  }
  func.func @transform_1(%arg0: i32) -> (i32, i32) {
    %c0_i32 = arith.constant 0 : i32
    %c0_i32_0 = arith.constant 0 : i32
    return %arg0, %c0_i32 : i32, i32
  }
  func.func @transform_2(%arg0: i32) -> (i32, i32, i32) {
    %c0_i32 = arith.constant 0 : i32
    %c0_i32_0 = arith.constant 0 : i32
    %c0_i32_1 = arith.constant 0 : i32
    return %c0_i32, %arg0, %c0_i32_0 : i32, i32, i32
  }
  func.func @transform_3(%arg0: i32) -> (i32, i32) {
    %c0_i32 = arith.constant 0 : i32
    %c0_i32_0 = arith.constant 0 : i32
    return %arg0, %c0_i32 : i32, i32
  }
}

</mosaic_0001>

<bundles_post_ra>
// kernel: tpu_custom_call.1
= control target key start
LH: loop header
LB: loop body
LE: loop exit
PB: predicated region body
PF: predicated region fallthrough
CT: control target
= control target key end

     0   :  { %8 = vsyncpa [#allocation5], 0  ;;  %s746_s0 = inlined_call_operand.hbm [shape: f32[63], index: 0, kind: input, shape index: {}]   ;;  %s747_s1 = inlined_call_operand.hbm [shape: f32[8,128], index: 1, kind: input, shape index: {}]   ;;  %s748_s2 = inlined_call_operand.hbm [shape: f32[4,8,128], index: 2, kind: input, shape index: {}]   ;;  %s749_s3 = inlined_call_operand.hbm [shape: f32[8,128], index: 3, kind: output, shape index: {}]  }
   0x1   :  { %9 = vsyncpa [#allocation3], 0 }
   0x2   :  { %10 = vsyncpa [#allocation8], 0 }
   0x3   :  { %11 = vsyncpa [#allocation4], 0  ;;  %s405_s14 = scalar_lea.hbm %s746_s0, 16 }
   0x4   :  { %p406_p0 = scmp.ne.s32.totalorder %s746_s0, %s405_s14  ;;  %p409_p1 = scmp.lt.u32.totalorder %s405_s14, %s746_s0 }
   0x6   :  { %p411_p2 = pnand %p409_p1, %p406_p0 }
   0x8   :  { %414 = shalt.err (!%p411_p2)
}
   0x9   :  { %s489_s19 = smov [#allocation2]   ;;  %s490_s22 = smov [#allocation6]  }
   0xa   :  { %19 = dma.hbm_to_smem %s746_s0, 16, %s489_s19, [#allocation5]  }
   0xb   :  { %s26_s23 = sshll.u32 %s490_s22, 4  ;;  %s491_s24 = smov [#allocation7]   ;;  %s27_s23 = int_to_ptr.vmem [resolvable:$true] %s26_s23 }
   0xc   :  { %s35_s25 = sshll.u32 %s491_s24, 4  ;;  %s415_s28 = scalar_lea.hbm %s747_s1, 128  ;;  %s36_s25 = int_to_ptr.vmem [resolvable:$true] %s35_s25 }
   0xd   :  { %p416_p3 = scmp.ne.s32.totalorder %s747_s1, %s415_s28  ;;  %p419_p4 = scmp.lt.u32.totalorder %s415_s28, %s747_s1 }
   0xf   :  { %p421_p5 = pnand %p419_p4, %p416_p3 }
  0x11   :  { %424 = shalt.err (!%p421_p5)
}
  0x12   :  { %s425_s0 = scalar_lea.vmem %s27_s23, 128  ;;  %p430_p7 = scmp.lt.s32.totalorder %s27_s23, %s27_s23 }
  0x13   :  { %p426_p6 = scmp.ne.s32.totalorder %s27_s23, %s425_s0  ;;  %p431_p8 = scmp.lt.s32.totalorder %s425_s0, %s425_s0 }
  0x15   :  { %p432_p9 = por %p431_p8, %p430_p7 }
  0x17   :  { %p433_p10 = pnand %p432_p9, %p426_p6 }
  0x19   :  { %436 = shalt.err (!%p433_p10)
}
  0x1a   :  { %29 = dma.hbm_to_vmem [thread:$0]  %s747_s1, 128, %s27_s23, [#allocation3]  }
  0x1b   :  { %s437_s10 = scalar_lea.hbm %s748_s2, 512 }
  0x1c   :  { %p438_p11 = scmp.ne.s32.totalorder %s748_s2, %s437_s10  ;;  %p441_p12 = scmp.lt.u32.totalorder %s437_s10, %s748_s2 }
  0x1e   :  { %p443_p13 = pnand %p441_p12, %p438_p11 }
  0x20   :  { %446 = shalt.err (!%p443_p13)
}
  0x21   :  { %s447_s15 = scalar_lea.vmem %s36_s25, 512  ;;  %p452_p1 = scmp.lt.s32.totalorder %s36_s25, %s36_s25 }
  0x22   :  { %p448_p0 = scmp.ne.s32.totalorder %s36_s25, %s447_s15  ;;  %p453_p2 = scmp.lt.s32.totalorder %s447_s15, %s447_s15 }
  0x24   :  { %p454_p3 = por %p453_p2, %p452_p1 }
  0x26   :  { %p455_p4 = pnand %p454_p3, %p448_p0 }
  0x28   :  { %458 = shalt.err (!%p455_p4)
}
  0x29   :  { %s492_s1 = smov 128   ;;  %s493_s16 = smov 8  }
  0x2a   :  { %41 = dma.hbm_to_vmem [thread:$0]  %s748_s2, 512, %s36_s25, [#allocation8], %s492_s1, %s492_s1, %s493_s16  }
  0x2b   :  { %481 = dma.done.wait [#allocation5], 16  }
  0x2c   :  { %482 = vsyncadd [#allocation5], 4294967280 }
  0x2d   :  { %483 = dma.done.wait [#allocation3], 128  }
  0x2e   :  { %484 = vsyncadd [#allocation3], 4294967168 }
  0x2f   :  { %485 = dma.done.wait [#allocation8], 512  }
  0x30   :  { %486 = vsyncadd [#allocation8], 4294966784 }
  0x31   :  { %51 = sfence }
  0x32   :  { %s551_s19 = sld [smem:[#allocation2 + $0x1e]]  ;;  %s553_s20 = sld [smem:[#allocation2 + $0x14]]  ;;  %v563_v0 = vld [vmem:[#allocation7] sm:$0xff]  ;;  %v565_v1 = vld [vmem:[#allocation7 + $0x8] sm:$0xff]  ;;  %v571_v2 = vld [vmem:[#allocation7 + $0x10] sm:$0xff] }
  0x33   :  { %s55_s21 = sld [smem:[#allocation2]]  ;;  %s323_s22 = sld [smem:[#allocation2 + $0x1]]  ;;  %v573_v3 = vld [vmem:[#allocation7 + $0x18] sm:$0xff] }
  0x34   :  { %s324_s23 = sld [smem:[#allocation2 + $0x2]]  ;;  %s325_s24 = sld [smem:[#allocation2 + $0x3]] }
  0x35   :  { %s555_s26 = sld [smem:[#allocation2 + $0x19]]  ;;  %s557_s27 = sld [smem:[#allocation2 + $0x15]] }
  0x36   :  { %s559_s2 = sld [smem:[#allocation2 + $0x4]]  ;;  %s561_s25 = sld [smem:[#allocation2 + $0x5]] }
  0x37   :  { %s567_s28 = sld [smem:[#allocation2 + $0x6]]  ;;  %s569_s29 = sld [smem:[#allocation2 + $0x7]] }
  0x38   :  { %s575_s30 = sld [smem:[#allocation2 + $0x1a]]  ;;  %s577_s4 = sld [smem:[#allocation2 + $0x16]]  ;;  %v59_v5 = vstv %s553_s20  ;;  %v86_v13 = vstv %s551_s19 }
  0x39   :  { %v57_v4 = vstv %s55_s21  ;;  %v65_v6 = vstv %s323_s22  ;;  %s580_s5 = sld [smem:[#allocation2 + $0x8]]  ;;  %s582_s0 = sld [smem:[#allocation2 + $0x9]] }
  0x3a   :  { %v58_v7 = vmul.f32 %v57_v4, %v563_v0  ;;  %v66_v8 = vmul.f32 %v65_v6, %v565_v1  ;;  %v72_v9 = vstv %s324_s23  ;;  %v79_v10 = vstv %s325_s24  ;;  %s586_s6 = sld [smem:[#allocation2 + $0xa]]  ;;  %s588_s7 = sld [smem:[#allocation2 + $0xb]] }
  0x3b   :  { %v73_v11 = vmul.f32 %v72_v9, %v571_v2  ;;  %v80_v12 = vmul.f32 %v79_v10, %v573_v3  ;;  %s593_s8 = sld [smem:[#allocation2 + $0x17]]  ;;  %v92_v16 = vstv %s557_s27  ;;  %s598_s9 = sld [smem:[#allocation2 + $0xc]]  ;;  %v84_v23 = vstv %s555_s26 }
  0x3c   :  { %v60_v14 = vadd.f32 %v59_v5, %v58_v7  ;;  %v90_v15 = vstv %s559_s2  ;;  %v95_v17 = vstv %s561_s25  ;;  %s600_s10 = sld [smem:[#allocation2 + $0xd]]  ;;  %s606_s11 = sld [smem:[#allocation2 + $0xe]] }
  0x3d   :  { %v91_v18 = vmul.f32 %v90_v15, %v563_v0  ;;  %v96_v19 = vmul.f32 %v95_v17, %v565_v1  ;;  %v99_v20 = vstv %s567_s28  ;;  %v103_v21 = vstv %s569_s29  ;;  %s608_s12 = sld [smem:[#allocation2 + $0xf]]  ;;  %s613_s13 = sld [smem:[#allocation2 + $0x1b]] }
  0x3e   :  { %v67_v22 = vadd.f32 %v66_v8, %v60_v14  ;;  %v100_v24 = vmul.f32 %v99_v20, %v571_v2  ;;  %v104_v25 = vmul.f32 %v103_v21, %v573_v3  ;;  %v115_v28 = vstv %s577_s4  ;;  %s618_s14 = sld [smem:[#allocation2 + $0x18]]  ;;  %s625_s1 = sld [smem:[#allocation2 + $0x11]] }
  0x3f   :  { %v93_v26 = vadd.f32 %v92_v16, %v91_v18  ;;  %v113_v27 = vstv %s580_s5  ;;  %v118_v29 = vstv %s582_s0  ;;  %s620_s15 = sld [smem:[#allocation2 + $0x10]]  ;;  %v108_v35 = vstv %s575_s30  ;;  %s630_s16 = sld [smem:[#allocation2 + $0x12]]  ;;  %v52_v18 = vld [vmem:[#allocation6] sm:$0xff] }
  0x40   :  { %v74_v30 = vadd.f32 %v73_v11, %v67_v22  ;;  %v114_v31 = vmul.f32 %v113_v27, %v563_v0  ;;  %v119_v32 = vmul.f32 %v118_v29, %v565_v1  ;;  %v122_v33 = vstv %s586_s6  ;;  %s634_s17 = sld [smem:[#allocation2 + $0x13]]  ;;  %s641_s18 = sld [smem:[#allocation2 + $0x1c]] }
  0x41   :  { %v97_v34 = vadd.f32 %v96_v19, %v93_v26  ;;  %v123_v36 = vmul.f32 %v122_v33, %v571_v2  ;;  %v126_v37 = vstv %s588_s7  ;;  %v136_v41 = vstv %s598_s9  ;;  %s645_s20 = sld [smem:[#allocation2 + $0x1d]]  ;;  %s649_s21 = sld [smem:[#allocation2 + $0x1f]] }
  0x42   :  { %v81_v38 = vadd.f32 %v80_v12, %v74_v30  ;;  %v116_v39 = vadd.f32 %v115_v28, %v114_v31  ;;  %v127_v40 = vmul.f32 %v126_v37, %v573_v3  ;;  %v137_v43 = vmul.f32 %v136_v41, %v563_v0  ;;  %s651_s22 = sld [smem:[#allocation2 + $0x20]]  ;;  %s655_s23 = sld [smem:[#allocation2 + $0x2f]] }
  0x43   :  { %v101_v42 = vadd.f32 %v100_v24, %v97_v34  ;;  %v138_v44 = vstv %s593_s8  ;;  %v141_v45 = vstv %s600_s10  ;;  %v145_v49 = vstv %s606_s11  ;;  %s657_s24 = sld [smem:[#allocation2 + $0x21]]  ;;  %s663_s26 = sld [smem:[#allocation2 + $0x22]] }
  0x44   :  { %v83_v46 = vmax.f32 %v81_v38, 0.0  ;;  %v120_v47 = vadd.f32 %v119_v32, %v116_v39  ;;  %v142_v48 = vmul.f32 %v141_v45, %v565_v1  ;;  %v139_v51 = vadd.f32 %v138_v44, %v137_v43  ;;  %s665_s27 = sld [smem:[#allocation2 + $0x30]]  ;;  %s669_s2 = sld [smem:[#allocation2 + $0x23]] }
  0x45   :  { %v105_v50 = vadd.f32 %v104_v25, %v101_v42  ;;  %v146_v52 = vmul.f32 %v145_v49, %v571_v2  ;;  %v149_v53 = vstv %s608_s12  ;;  %v131_v56 = vstv %s613_s13  ;;  %s671_s25 = sld [smem:[#allocation2 + $0x24]]  ;;  %s675_s19 = sld [smem:[#allocation2 + $0x31]] }
  0x46   :  { %v85_v54 = vmul.f32 %v84_v23, %v83_v46  ;;  %v124_v55 = vadd.f32 %v123_v36, %v120_v47  ;;  %v150_v57 = vmul.f32 %v149_v53, %v573_v3  ;;  %v143_v59 = vadd.f32 %v142_v48, %v139_v51  ;;  %s677_s28 = sld [smem:[#allocation2 + $0x25]]  ;;  %s679_s29 = sld [smem:[#allocation2 + $0x26]] }
  0x47   :  { %v107_v58 = vmax.f32 %v105_v50, 0.0  ;;  %v159_v60 = vstv %s620_s15  ;;  %v161_v61 = vstv %s618_s14  ;;  %v164_v5 = vstv %s625_s1  ;;  %s681_s30 = sld [smem:[#allocation2 + $0x32]]  ;;  %s685_s4 = sld [smem:[#allocation2 + $0x27]] }
  0x48   :  { %v87_v62 = vadd.f32 %v86_v13, %v85_v54  ;;  %v128_v63 = vadd.f32 %v127_v40, %v124_v55  ;;  %v160_v4 = vmul.f32 %v159_v60, %v563_v0  ;;  %v147_v7 = vadd.f32 %v146_v52, %v143_v59  ;;  %s687_s5 = sld [smem:[#allocation2 + $0x29]]  ;;  %s689_s0 = sld [smem:[#allocation2 + $0x28]] }
  0x49   :  { %v109_v6 = vmul.f32 %v108_v35, %v107_v58  ;;  %v165_v8 = vmul.f32 %v164_v5, %v565_v1  ;;  %v168_v9 = vstv %s630_s16  ;;  %v172_v0 = vstv %s634_s17  ;;  %s691_s6 = sld [smem:[#allocation2 + $0x2a]]  ;;  %s694_s7 = sld [smem:[#allocation2 + $0x2b]] }
  0x4a   :  { %v130_v10 = vmax.f32 %v128_v63, 0.0  ;;  %v162_v11 = vadd.f32 %v161_v61, %v160_v4  ;;  %v169_v12 = vmul.f32 %v168_v9, %v571_v2  ;;  %v151_v14 = vadd.f32 %v150_v57, %v147_v7  ;;  %s696_s8 = sld [smem:[#allocation2 + $0x2c]]  ;;  %s698_s9 = sld [smem:[#allocation2 + $0x2d]] }
  0x4b   :  { %v110_v13 = vadd.f32 %v109_v6, %v87_v62  ;;  %v154_v15 = vstv %s641_s18  ;;  %v173_v17 = vmul.f32 %v172_v0, %v573_v3  ;;  %v181_v21 = vstv %s649_s21  ;;  %s705_s10 = sld [smem:[#allocation2 + $0x2e]]  ;;  %s712_s11 = sld [smem:[#allocation2 + $0x33]] }
  0x4c   :  { %v132_v1 = vmul.f32 %v131_v56, %v130_v10  ;;  %v166_v16 = vadd.f32 %v165_v8, %v162_v11  ;;  %v153_v2 = vmax.f32 %v151_v14, 0.0  ;;  %v177_v23 = vstv %s645_s20  ;;  %s719_s12 = sld [smem:[#allocation2 + $0x34]]  ;;  %s724_s13 = sld [smem:[#allocation2 + $0x35]] }
  0x4d   :  { %v196_v24 = vstv %s657_s24  ;;  %v182_v25 = vmul.f32 %v181_v21, %v52_v18  ;;  %v184_v26 = vstv %s651_s22  ;;  %v188_v27 = vstv %s655_s23  ;;  %s728_s14 = sld [smem:[#allocation2 + $0x36]]  ;;  %s354_s15 = sld [smem:[#allocation2 + $0x37]] }
  0x4e   :  { %v133_v19 = vadd.f32 %v132_v1, %v110_v13  ;;  %v170_v20 = vadd.f32 %v169_v12, %v166_v16  ;;  %v155_v3 = vmul.f32 %v154_v15, %v153_v2  ;;  %v211_v28 = vstv %s669_s2  ;;  %s358_s1 = sld [smem:[#allocation2 + $0x38]]  ;;  %s362_s16 = sld [smem:[#allocation2 + $0x39]] }
  0x4f   :  { %v199_v31 = vstv %s663_s26  ;;  %v226_v32 = vstv %s677_s28  ;;  %v197_v33 = vmul.f32 %v196_v24, %v52_v18  ;;  %v203_v34 = vstv %s665_s27  ;;  %s366_s17 = sld [smem:[#allocation2 + $0x3a]]  ;;  %s370_s18 = sld [smem:[#allocation2 + $0x3b]] }
  0x50   :  { %v174_v22 = vadd.f32 %v173_v17, %v170_v20  ;;  %v156_v29 = vadd.f32 %v155_v3, %v133_v19  ;;  %v214_v35 = vstv %s671_s25  ;;  %v218_v36 = vstv %s675_s19  ;;  %s374_s20 = sld [smem:[#allocation2 + $0x3c]]  ;;  %s378_s21 = sld [smem:[#allocation2 + $0x3d]] }
  0x51   :  { %v212_v38 = vmul.f32 %v211_v28, %v52_v18  ;;  %v241_v39 = vstv %s685_s4  ;;  %v256_v40 = vstv %s687_s5  ;;  %v227_v41 = vmul.f32 %v226_v32, %v52_v18  ;;  %s382_s22 = sld [smem:[#allocation2 + $0x3e]]  ;;  %s494_s23 = smov [#allocation9]  }
  0x52   :  { %v176_v30 = vmax.f32 %v174_v22, 0.0  ;;  %v229_v42 = vstv %s679_s29  ;;  %v233_v43 = vstv %s681_s30  ;;  %v244_v44 = vstv %s689_s0  ;;  %s307_s24 = sshll.u32 %s494_s23, 4  ;;  %s308_s24 = int_to_ptr.vmem [resolvable:$true] %s307_s24 }
  0x53   :  { %v259_v46 = vstv %s691_s6  ;;  %v271_v47 = vstv %s694_s7  ;;  %v274_v48 = vstv %s696_s8  ;;  %v242_v49 = vmul.f32 %v241_v39, %v52_v18  ;;  %s459_s26 = scalar_lea.vmem %s308_s24, 128  ;;  %p464_p6 = scmp.lt.s32.totalorder %s308_s24, %s308_s24 }
  0x54   :  { %v178_v37 = vmul.f32 %v177_v23, %v176_v30  ;;  %v257_v50 = vmul.f32 %v256_v40, %v52_v18  ;;  %v272_v51 = vmul.f32 %v271_v47, %v52_v18  ;;  %v286_v52 = vstv %s698_s9  ;;  %p460_p5 = scmp.ne.s32.totalorder %s308_s24, %s459_s26  ;;  %p465_p7 = scmp.lt.s32.totalorder %s459_s26, %s459_s26 }
  0x55   :  { %v289_v60 = vstv %s705_s10  ;;  %v248_v6 = vstv %s712_s11  ;;  %v287_v8 = vmul.f32 %v286_v52, %v52_v18  ;;  %v263_v13 = vstv %s719_s12 }
  0x56   :  { %v179_v45 = vadd.f32 %v178_v37, %v156_v29  ;;  %v278_v15 = vstv %s724_s13  ;;  %v293_v2 = vstv %s728_s14  ;;  %v192_v20 = vstv %s354_s15  ;;  %p466_p8 = por %p465_p7, %p464_p6 }
  0x57   :  { %v207_v21 = vstv %s358_s1  ;;  %v222_v22 = vstv %s362_s16  ;;  %v252_v32 = vstv %s370_s18  ;;  %v282_v40 = vstv %s378_s21 }
  0x58   :  { %v185_v53 = vmul.f32 %v184_v26, %v179_v45  ;;  %v200_v54 = vmul.f32 %v199_v31, %v179_v45  ;;  %v215_v55 = vmul.f32 %v214_v35, %v179_v45  ;;  %v230_v56 = vmul.f32 %v229_v42, %v179_v45  ;;  %p467_p9 = pnand %p466_p8, %p460_p5 }
  0x59   :  { %v245_v57 = vmul.f32 %v244_v44, %v179_v45  ;;  %v260_v58 = vmul.f32 %v259_v46, %v179_v45  ;;  %v275_v59 = vmul.f32 %v274_v48, %v179_v45  ;;  %v290_v12 = vmul.f32 %v289_v60, %v179_v45 }
  0x5a   :  { %v186_v61 = vadd.f32 %v185_v53, %v182_v25  ;;  %v201_v62 = vadd.f32 %v200_v54, %v197_v33  ;;  %v216_v63 = vadd.f32 %v215_v55, %v212_v38  ;;  %v231_v4 = vadd.f32 %v230_v56, %v227_v41 }
  0x5b   :  { %v246_v5 = vadd.f32 %v245_v57, %v242_v49  ;;  %v261_v7 = vadd.f32 %v260_v58, %v257_v50  ;;  %v276_v1 = vadd.f32 %v275_v59, %v272_v51  ;;  %v291_v17 = vadd.f32 %v290_v12, %v287_v8 }
  0x5c   :  { %v189_v9 = vadd.f32 %v188_v27, %v186_v61  ;;  %v204_v10 = vadd.f32 %v203_v34, %v201_v62  ;;  %v219_v11 = vadd.f32 %v218_v36, %v216_v63  ;;  %v234_v0 = vadd.f32 %v233_v43, %v231_v4 }
  0x5d   :  { %v249_v14 = vadd.f32 %v248_v6, %v246_v5  ;;  %v264_v16 = vadd.f32 %v263_v13, %v261_v7  ;;  %v279_v18 = vadd.f32 %v278_v15, %v276_v1  ;;  %v294_v19 = vadd.f32 %v293_v2, %v291_v17 }
  0x5e   :  { %389 = vtanh.f32 %v189_v9  ;;  %v237_v27 = vstv %s366_s17  ;;  %v267_v36 = vstv %s374_s20  ;;  %v297_v44 = vstv %s382_s22 }
  0x5f   :  { %391 = vtanh.f32 %v204_v10 }
  0x60   :  { %393 = vtanh.f32 %v219_v11 }
  0x61   :  { %395 = vtanh.f32 %v234_v0 }
  0x62   :  { %397 = vtanh.f32 %v249_v14 }
  0x63   :  { %399 = vtanh.f32 %v264_v16 }
  0x64   :  { %401 = vtanh.f32 %v279_v18 }
  0x65   :  { %403 = vtanh.f32 %v294_v19 }
  0x68   :  { %v390_v3 = vpop.eup %389 }
  0x69   :  { %v392_v23 = vpop.eup %391  ;;  %v193_v24 = vmul.f32 %v390_v3, %v192_v20 }
  0x6a   :  { %v394_v25 = vpop.eup %393  ;;  %v208_v26 = vmul.f32 %v392_v23, %v207_v21 }
  0x6b   :  { %v396_v28 = vpop.eup %395  ;;  %v194_v29 = vadd.f32 0.5, %v193_v24  ;;  %v223_v30 = vmul.f32 %v394_v25, %v222_v22 }
  0x6c   :  { %v398_v31 = vpop.eup %397  ;;  %v238_v34 = vmul.f32 %v396_v28, %v237_v27 }
  0x6d   :  { %v209_v33 = vadd.f32 %v208_v26, %v194_v29  ;;  %v400_v35 = vpop.eup %399  ;;  %v253_v38 = vmul.f32 %v398_v31, %v252_v32 }
  0x6e   :  { %v402_v39 = vpop.eup %401  ;;  %v268_v42 = vmul.f32 %v400_v35, %v267_v36 }
  0x6f   :  { %v224_v37 = vadd.f32 %v223_v30, %v209_v33  ;;  %v404_v43 = vpop.eup %403  ;;  %v283_v46 = vmul.f32 %v402_v39, %v282_v40 }
  0x70   :  { %v298_v48 = vmul.f32 %v404_v43, %v297_v44 }
  0x71   :  { %v239_v41 = vadd.f32 %v238_v34, %v224_v37 }
  0x73   :  { %v254_v45 = vadd.f32 %v253_v38, %v239_v41 }
  0x75   :  { %v269_v47 = vadd.f32 %v268_v42, %v254_v45 }
  0x77   :  { %v284_v49 = vadd.f32 %v283_v46, %v269_v47 }
  0x79   :  { %v299_v50 = vadd.f32 %v298_v48, %v284_v49 }
  0x7b   :  { %300 = vst [vmem:[#allocation9] sm:$0xff] %v299_v50 }
  0x7c   :  { %470 = shalt.err (!%p467_p9)
}
  0x7d   :  { %s471_s25 = scalar_lea.hbm %s749_s3, 128 }
  0x7e   :  { %p472_p10 = scmp.ne.s32.totalorder %s749_s3, %s471_s25  ;;  %p475_p11 = scmp.lt.u32.totalorder %s471_s25, %s749_s3 }
  0x80   :  { %p477_p12 = pnand %p475_p11, %p472_p10 }
  0x82   :  { %480 = shalt.err (!%p477_p12)
}
  0x83   :  { %310 = dma.vmem_to_hbm [thread:$0]  %s308_s24, 128, %s749_s3, [#allocation4]  }
  0x84   :  { %487 = dma.done.wait [#allocation4], 128  }
  0x85   :  { %488 = vsyncadd [#allocation4], 4294967168 }
  0x86   :  { %314 = vsyncpa [#allocation3], 1 }
  0x87   :  { %315 = vsyncpa [#allocation8], 1 }
  0x88   :  { %316 = vsyncpa [#allocation4], 1 }
  0x89   :  { %317 = vsyncpa [#allocation5], 1 }

</bundles_post_ra>
